<compile_context>
chip_gen: v7x
topology: tpu7x:2x2x1
jax: 0.10.0
libtpu: 0.0.40
codegen_flags: <defaults>
</compile_context>

<pallas_src>
import math

import jax
import jax.numpy as jnp
from jax.experimental import pallas as pl
from jax.experimental.pallas import tpu as pltpu


# ----------------------------------------------------------------------------
# Path 1 (primary): zero-copy aliased pass-through.
# ----------------------------------------------------------------------------
def _alias_noop_kernel(x_ref, o_ref):
    # Contiguous reshape moves no data.  With input_output_aliases={0: 0} the
    # output buffer *is* the input buffer, so there is nothing to do here.
    del x_ref, o_ref


def _pallas_alias_passthrough(x):
    return pl.pallas_call(
        _alias_noop_kernel,
        out_shape=jax.ShapeDtypeStruct(x.shape, x.dtype),
        in_specs=[pl.BlockSpec(memory_space=pl.ANY)],
        out_specs=pl.BlockSpec(memory_space=pl.ANY),
        input_output_aliases={0: 0},
        cost_estimate=pl.CostEstimate(flops=0, transcendentals=0, bytes_accessed=0),
    )(x)


_ALIAS_PATH_OK = None


def _alias_path_available():
    """One-time capability probe for the zero-copy aliased kernel."""
    global _ALIAS_PATH_OK
    if _ALIAS_PATH_OK is None:
        try:
            probe = jnp.zeros((8, 128), jnp.float32)
            jax.block_until_ready(_pallas_alias_passthrough(probe))
            _ALIAS_PATH_OK = True
        except Exception:  # pragma: no cover - fall back to streaming copy
            _ALIAS_PATH_OK = False
    return _ALIAS_PATH_OK


# ----------------------------------------------------------------------------
# Path 2 (explicit copy / fallback): lane-dense streaming copy.
# ----------------------------------------------------------------------------
def _copy_kernel(x_ref, o_ref):
    o_ref[...] = x_ref[...]


_TARGET_BLOCK_BYTES = 8 << 20   # 8 MiB blocks: step overhead < ~3% of stream time
_MIN_GRID_STEPS = 8             # 2 TensorCores (v7x) x 4 pipeline stages
_MAX_LANES = 2048
_VMEM_CAP_BYTES = 48 << 20      # stay clear of v7x's 64 MiB physical VMEM


def _vmem_limit_for_block(block_bytes):
    # in + out, double-buffered -> ~4 buffers, plus headroom.
    return int(min(_VMEM_CAP_BYTES, max(16 << 20, 4 * block_bytes + (4 << 20))))


def _plan_lane_dense(total, itemsize):
    """Factor `total` into (rows, cols, block_rows): cols a multiple of 128
    (unmasked vld/vst), block sized ~8 MiB while keeping >= 8 grid steps."""
    if total % 128 != 0:
        return None

    sub = 8 * max(1, 4 // itemsize)          # sublane multiple: f32 8, bf16 16, int8 32
    cols, rows = 128, total // 128
    # Widen the lane axis (wider unmasked stores) while the factorization
    # allows and there are still plenty of rows for grid parallelism.
    while cols < _MAX_LANES and rows % 2 == 0 and (rows // 2) >= sub * _MIN_GRID_STEPS:
        cols *= 2
        rows //= 2

    row_bytes = cols * itemsize
    budget_rows = max(1, _TARGET_BLOCK_BYTES // row_bytes)
    depth_rows = max(1, pl.cdiv(rows, _MIN_GRID_STEPS))   # keep >= 8 grid steps
    block_rows = min(budget_rows, depth_rows)

    if block_rows >= rows:
        return rows, cols, rows               # single full-extent block (always legal)

    # Snap to a sublane multiple, preferring an exact divisor of `rows` so the
    # last tile is not partial (keeps every store unmasked).
    block_rows = max(sub, (block_rows // sub) * sub)
    for cand in range(block_rows, sub - 1, -sub):
        if rows % cand == 0:
            block_rows = cand
            break
    block_rows = min(block_rows, rows)
    return rows, cols, block_rows


def _pallas_copy_2d(x2d, block_rows):
    rows, cols = x2d.shape
    itemsize = x2d.dtype.itemsize
    block_bytes = block_rows * cols * itemsize
    return pl.pallas_call(
        _copy_kernel,
        out_shape=jax.ShapeDtypeStruct((rows, cols), x2d.dtype),
        grid_spec=pltpu.PrefetchScalarGridSpec(
            num_scalar_prefetch=0,
            grid=(pl.cdiv(rows, block_rows),),
            in_specs=[pl.BlockSpec((block_rows, cols), lambda i: (i, 0))],
            out_specs=pl.BlockSpec((block_rows, cols), lambda i: (i, 0)),
        ),
        compiler_params=pltpu.CompilerParams(
            dimension_semantics=("parallel",),
            vmem_limit_bytes=_vmem_limit_for_block(block_bytes),
        ),
        cost_estimate=pl.CostEstimate(
            flops=0,
            transcendentals=0,
            bytes_accessed=2 * rows * cols * itemsize,
        ),
    )(x2d)


def _pallas_copy_1d_tiled(x2d):
    """Copy for element counts not divisible by 128: view as (1, total) and
    tile along the lane axis with 128-aligned chunks; only the final chunk's
    store is masked.  Removes the old whole-array-in-one-block size cliff."""
    _, total = x2d.shape
    itemsize = x2d.dtype.itemsize
    if total * itemsize <= (4 << 20):
        chunk = total                                   # full extent: always legal
    else:
        chunk = max(128, ((_TARGET_BLOCK_BYTES // 2 // itemsize) // 128) * 128)
    block_bytes = chunk * itemsize
    return pl.pallas_call(
        _copy_kernel,
        out_shape=jax.ShapeDtypeStruct((1, total), x2d.dtype),
        grid_spec=pltpu.PrefetchScalarGridSpec(
            num_scalar_prefetch=0,
            grid=(pl.cdiv(total, chunk),),
            in_specs=[pl.BlockSpec((1, chunk), lambda i: (0, i))],
            out_specs=pl.BlockSpec((1, chunk), lambda i: (0, i)),
        ),
        compiler_params=pltpu.CompilerParams(
            dimension_semantics=("parallel",),
            vmem_limit_bytes=_vmem_limit_for_block(block_bytes),
        ),
        cost_estimate=pl.CostEstimate(
            flops=0,
            transcendentals=0,
            bytes_accessed=2 * total * itemsize,
        ),
    )(x2d)


# ----------------------------------------------------------------------------
# Helpers / public wrapper
# ----------------------------------------------------------------------------
def _resolve_dims(total, dims):
    """Resolve a torch-style reshape dims tuple (supports a single -1)."""
    if len(dims) == 1 and isinstance(dims[0], (tuple, list)):
        dims = tuple(dims[0])
    dims = [int(d) for d in dims]
    neg = [i for i, d in enumerate(dims) if d == -1]
    if len(neg) > 1:
        raise ValueError("only one dimension can be -1")
    if neg:
        known = 1
        for d in dims:
            if d != -1:
                known *= d
        if known == 0 or total % known != 0:
            raise ValueError(f"cannot reshape {total} elements into {dims}")
        dims[neg[0]] = total // known
    if math.prod(dims) != total:
        raise ValueError(f"cannot reshape {total} elements into {dims}")
    return tuple(dims)


def pallas_reshape(x, dims, *, force_copy=False):
    """Equivalent of torch.Tensor.reshape(*dims) for a static `dims`."""
    total = int(x.size)
    out_dims = _resolve_dims(total, dims)
    if total == 0:
        return jnp.reshape(x, out_dims)

    if not force_copy and _alias_path_available():
        # Zero-copy: output aliases input; shape change is metadata only.
        y = _pallas_alias_passthrough(x)
        return jnp.reshape(y, out_dims)

    # Explicit materializing copy (HBM -> VMEM -> HBM, lane-dense, tiled).
    itemsize = x.dtype.itemsize
    plan = _plan_lane_dense(total, itemsize)
    if plan is not None:
        rows, cols, block_rows = plan
        y2d = _pallas_copy_2d(jnp.reshape(x, (rows, cols)), block_rows)
    else:
        y2d = _pallas_copy_1d_tiled(jnp.reshape(x, (1, total)))
    return jnp.reshape(y2d, out_dims)


class Reshape:
    """Mirror of the PyTorch nn.Module: Reshape(*dims)(x) == x.reshape(dims)."""

    def __init__(self, *dims):
        self.dims = dims

    def __call__(self, x):
        return pallas_reshape(x, self.dims)


# ----------------------------------------------------------------------------
# Self-test
# ----------------------------------------------------------------------------
if __name__ == "__main__":
    key = jax.random.PRNGKey(0)
    k1, k2, k3 = jax.random.split(key, 3)

    # Canonical use: flatten spatial/channel dims of an NCHW activation.
    x = jax.random.normal(k1, (2, 4, 16, 16), dtype=jnp.float32)

    # Primary (zero-copy aliased) path.
    y = jax.block_until_ready(Reshape(2, -1)(x))
    assert y.shape == (2, 1024) and y.dtype == x.dtype
    assert bool(jnp.array_equal(y, jnp.reshape(x, (2, 1024))))

    y2 = jax.block_until_ready(Reshape(-1, 64)(x))
    assert y2.shape == (32, 64)
    assert bool(jnp.array_equal(y2, jnp.reshape(x, (32, 64))))

    # Explicit lane-dense streaming-copy Pallas path.
    yc = jax.block_until_ready(pallas_reshape(x, (2, -1), force_copy=True))
    assert yc.shape == (2, 1024)
    assert bool(jnp.array_equal(yc, jnp.reshape(x, (2, 1024))))

    # bf16 through the copy path (packed-sublane block sizing).
    xb = jax.random.normal(k2, (2, 4, 16, 16), dtype=jnp.float32).astype(jnp.bfloat16)
    yb = jax.block_until_ready(pallas_reshape(xb, (8, 256), force_copy=True))
    assert yb.shape == (8, 256) and yb.dtype == jnp.bfloat16
    assert bool(jnp.array_equal(yb, jnp.reshape(xb, (8, 256))))

    # Element count not divisible by 128 -> tiled 1-D fallback copy path.
    x4 = jax.random.normal(k3, (3, 5, 7), dtype=jnp.float32)
    y4 = jax.block_until_ready(pallas_reshape(x4, (7, 15), force_copy=True))
    assert y4.shape == (7, 15)
    assert bool(jnp.array_equal(y4, jnp.reshape(x4, (7, 15))))

    # Non-128-divisible shape on the primary aliased path.
    y5 = jax.block_until_ready(Reshape(7, -1)(x4))
    assert y5.shape == (7, 15)
    assert bool(jnp.array_equal(y5, jnp.reshape(x4, (7, 15))))

    print("KERNEL_OK")
</pallas_src>

<mosaic_0001>
module attributes {stable_mosaic.version = 11 : i64} {
  func.func @_alias_noop_kernel(%arg0: memref<8x128xf32, #tpu.memory_space<any>>, %arg1: memref<8x128xf32, #tpu.memory_space<any>>) attributes {dimension_semantics = [], scalar_prefetch = 0 : i64, scratch_operands = 0 : i64, tpu.core_type = #tpu.core_type<tc>} {
    return
  }
}

module attributes {stable_mosaic.version = 11 : i64} {
  func.func @_copy_kernel(%arg0: i32, %arg1: memref<8x128xf32, #tpu.memory_space<vmem>>, %arg2: memref<8x128xf32, #tpu.memory_space<vmem>>) attributes {dimension_semantics = [#tpu.dimension_semantics<parallel>], iteration_bounds = array<i64: 2>, scalar_prefetch = 0 : i64, scratch_operands = 0 : i64, tpu.core_type = #tpu.core_type<tc>, window_params = [{transform_indices = @transform_0, window_bounds = array<i64: 8, 128>}, {transform_indices = @transform_1, window_bounds = array<i64: 8, 128>}]} {
    %c0 = arith.constant 0 : index
    %c0_0 = arith.constant 0 : index
    %0 = vector.load %arg1[%c0, %c0_0] : memref<8x128xf32, #tpu.memory_space<vmem>>, vector<8x128xf32>
    %c0_1 = arith.constant 0 : index
    %c0_2 = arith.constant 0 : index
    %1 = vector.load %arg2[%c0_1, %c0_2] : memref<8x128xf32, #tpu.memory_space<vmem>>, vector<8x128xf32>
    tpu.vector_store %arg2[%c0_1, %c0_2], %0 {strides = array<i32>} : memref<8x128xf32, #tpu.memory_space<vmem>>, vector<8x128xf32>,
    return
  }
  func.func @transform_0(%arg0: i32) -> (i32, i32) {
    %c0_i32 = arith.constant 0 : i32
    %c0_i32_0 = arith.constant 0 : i32
    return %arg0, %c0_i32 : i32, i32
  }
  func.func @transform_1(%arg0: i32) -> (i32, i32) {
    %c0_i32 = arith.constant 0 : i32
    %c0_i32_0 = arith.constant 0 : i32
    return %arg0, %c0_i32 : i32, i32
  }
}

</mosaic_0001>

<bundles_post_ra>
// kernel: tpu_custom_call.1
= control target key start
LH: loop header
LB: loop body
LE: loop exit
PB: predicated region body
PF: predicated region fallthrough
CT: control target
= control target key end

     0   :  { %s16_s0 = inlined_call_operand.hbm [shape: f32[8,128], index: 0, kind: input, shape index: {}, may-alias: {0,1}]   ;;  %s17_s1 = inlined_call_operand.hbm [shape: f32[8,128], index: 1, kind: output, shape index: {}, may-alias: {0,1}]  }

// kernel: tpu_custom_call.1
= control target key start
LH: loop header
LB: loop body
LE: loop exit
PB: predicated region body
PF: predicated region fallthrough
CT: control target
= control target key end

     0   :  { %6 = vsyncpa [#allocation3], 0  ;;  %s547_s0 = inlined_call_operand.hbm [shape: f32[16,128], index: 0, kind: input, shape index: {}]   ;;  %s548_s1 = inlined_call_operand.hbm [shape: f32[16,128], index: 1, kind: output, shape index: {}]  }
   0x1   :  { %8 = vsyncpa [#allocation3 + $0x1], 0 }
   0x2   :  { %9 = vsyncpa [#allocation4], 0 }
   0x3   :  { %11 = vsyncpa [#allocation4 + $0x1], 0  ;;  %s386_s6 = smov 0   ;;  %s388_s7 = smov 0  }
   0x4   :  { %s390_s8 = smov 0   ;;  %s392_s9 = smov 0  }
   0x5 LB: > { %s407_s10 = sadd.s32 4294967295, %s372_s9   ;;  %s218_s11 = sadd.s32 4294967294, %s372_s9   ;;  %s372_s9 = sphi %s392_s9, %s563_s9   ;;  %s368_s8 = sphi %s390_s8, %s562_s8   ;;  %s364_s7 = sphi %s388_s7, %s561_s7   ;;  %s360_s6 = sphi %s386_s6, %s560_s6  }
   0x6   : > { %s411_s12 = sadd.s32 1, %s372_s9   ;;  %s24_s13 = sadd.s32 1, %s368_s8 }
   0x7   : > { %s21_s14 = ssub.s32 %s372_s9, %s411_s12  ;;  %p31_p0 = scmp.ne.s32.totalorder %s368_s8, %s364_s7 }
   0x8   : > { %p22_p1 = scmp.eq.s32.totalorder %s21_s14, 0  ;;  %p32_p2 = scmp.eq.s32.totalorder %s372_s9, 0 }
   0x9   : > { %p37_p3 = scmp.ne.s32.totalorder %s364_s7, %s360_s6  ;;  %p38_p4 = scmp.eq.s32.totalorder %s407_s10, 0 }
   0xa   : > { %s423_s15 = scalar_select %p22_p1, %s368_s8, %s24_s13  }
   0xb   : > { %p425_p5 = por %p32_p2, %p31_p0  ;;  %p429_p6 = por %p38_p4, %p37_p3 }
   0xc   : > { %p61_p7 = scmp.eq.s32.totalorder %s407_s10, 1  ;;  %p67_p8 = scmp.eq.s32.totalorder %s218_s11, 1 }
   0xd   : > { %p242_p10 = scmp.lt.s32.totalorder %s372_s9, 2  ;;  %s87_s20 = sand.u32 1, %s368_s8  }
   0xe   : > { %p436_p11 = por %p61_p7, %p31_p0  ;;  %p440_p12 = por %p67_p8, %p37_p3 }
   0xf   : > { %s222_s21 = sshll.u32 %s372_s9, 7  ;;  %s221_s22 = sshll.u32 %s87_s20, 3 }
  0x10   : > { %s552_s18 = scalar_select %p436_p11, 1, 0 }
  0x11   : > { %s553_s19 = scalar_select %p440_p12, 1, 0 }
  0x12   : > { %s449_s25 = scalar_lea.hbm %s547_s0, %s222_s21  ;;  %s91_s26 = scalar_lea.vmem [#allocation2], %s221_s22 }
  0x13   : > { %s98_s27 = sshll.u32 %s91_s26, 4  ;;  %p453_p13 = pnand %p242_p10, %p425_p5  ;;  %s457_s27 = int_to_ptr.vmem [resolvable:$true] %s98_s27 }
  0x14   : > { %s88_s29 = scalar_lea.sflag [#allocation3], %s87_s20  ;;  %s276_s30 = scalar_lea.hbm %s449_s25, 128 }
  0x15   : > { %p277_p2 = scmp.ne.s32.totalorder %s449_s25, %s276_s30  ;;  %p278_p3 = pneg %p453_p13 }
  0x16   : > { %s281_s4 = scalar_lea.hbm %s547_s0, 256  ;;  %p282_p5 = scmp.lt.u32.totalorder %s449_s25, %s547_s0 }
  0x17   : > { %p279_p4 = pnand %p278_p3, %p277_p2  ;;  %p283_p8 = scmp.lt.u32.totalorder %s281_s4, %s276_s30 }
  0x18   : > { %p285_p9 = scmp.lt.u32.totalorder %s276_s30, %s449_s25 }
  0x19   : > { %p280_p7 = pneg %p279_p4  ;;  %p284_p10 = por %p283_p8, %p282_p5 }
  0x1b   : > { %p286_p0 = por %p285_p9, %p284_p10 }
  0x1d   : > { %p287_p1 = pnand %p286_p0, %p280_p7 }
  0x1f   : > { %290 = shalt.err (!%p287_p1)
}
  0x20   : > { %s291_s13 = scalar_lea.vmem %s457_s27, 128  ;;  %s374_s14 = smov [#allocation2]  }
  0x21   : > { %p292_p2 = scmp.ne.s32.totalorder %s457_s27, %s291_s13  ;;  %s296_s16 = sshll.u32 %s374_s14, 4  ;;  %s297_s16 = int_to_ptr.vmem [resolvable:$false] %s296_s16 }
  0x22   : > { %s298_s20 = scalar_lea.vmem %s297_s16, 256  ;;  %p299_p11 = scmp.lt.s32.totalorder %s457_s27, %s297_s16 }
  0x23   : > { %p294_p4 = pnand %p292_p2, %p278_p3  ;;  %p300_p5 = scmp.lt.s32.totalorder %s298_s20, %s291_s13 }
  0x25   : > { %p295_p12 = pneg %p294_p4  ;;  %p301_p8 = por %p300_p5, %p299_p11 }
  0x27   : > { %p302_p9 = pnand %p301_p8, %p295_p12 }
  0x29   : > { %305 = shalt.err (!%p302_p9)
}
  0x2a   : > { %237 = dma.hbm_to_vmem [thread:$0]  (!%p453_p13), %s449_s25, 128, %s457_s27, %s88_s29  }
  0x2b   : > { %p555_p0 = scmp.lt.s32.totalorder %s372_s9, 3  ;;  %p556_p1 = scmp.ge.s32.totalorder %s372_s9, 1 }
  0x2d   : > { %p104_p3 = pnand %p556_p1, %p555_p0 }
  0x2e   : > { %s491_s21 = sand.u32 (!%p104_p3), 1, %s364_s7  }
  0x2f   : > { %107 = sbr.rel (%p104_p3) target bundleno = 81 (0x51), region = 24  ;;  %s224_s22 = sshll.u32 (!%p104_p3), %s491_s21, 3 }
  0x30   : > { %s110_s23 = scalar_lea.sflag (!%p104_p3), [#allocation3], %s491_s21  ;;  %s113_s24 = scalar_lea.vmem (!%p104_p3), [#allocation2], %s224_s22 }
  0x36   : > { %351 = dma.done.wait (%p429_p6), %s110_s23, 128  }
  0x37   : > { %353 = vsyncadd (%p429_p6), %s110_s23, 4294967168  ;;  %s131_s25 = scalar_lea.vmem [#allocation5], %s224_s22  ;;  %s227_s27 = sshll.u32 %s407_s10, 7  ;;  %v132_v0 = vld [vmem:[%s113_s24] sm:$0xff] }
  0x38   : > { %s148_s26 = sshll.u32 %s131_s25, 4  ;;  %s505_s30 = scalar_lea.hbm %s548_s1, %s227_s27  ;;  %133 = vst [vmem:[%s131_s25] sm:$0xff] %v132_v0  ;;  %s500_s26 = int_to_ptr.vmem [resolvable:$true] %s148_s26 }
  0x39   : > { %s135_s17 = scalar_lea.sflag [#allocation4], %s491_s21  ;;  %s306_s2 = scalar_lea.vmem %s500_s26, 128 }
  0x3a   : > { %p307_p6 = scmp.ne.s32.totalorder %s500_s26, %s306_s2  ;;  %p557_p11 = scmp.ne.s32.totalorder %s552_s18, 0 }
  0x3b   : > { %s375_s3 = smov [#allocation5]  }
  0x3c   : > { %p308_p12 = pnand %p307_p6, %p557_p11  ;;  %s310_s10 = sshll.u32 %s375_s3, 4  ;;  %s311_s10 = int_to_ptr.vmem [resolvable:$false] %s310_s10 }
  0x3d   : > { %s312_s4 = scalar_lea.vmem %s311_s10, 256  ;;  %p313_p7 = scmp.lt.s32.totalorder %s500_s26, %s311_s10 }
  0x3e   : > { %p309_p13 = pneg %p308_p12  ;;  %p314_p10 = scmp.lt.s32.totalorder %s312_s4, %s306_s2 }
  0x40   : > { %p315_p2 = por %p314_p10, %p313_p7 }
  0x42   : > { %p316_p4 = pnand %p315_p2, %p309_p13 }
  0x44   : > { %319 = shalt.err (!%p316_p4)
}
  0x45   : > { %s320_s5 = scalar_lea.hbm %s505_s30, 128  ;;  %s324_s14 = scalar_lea.hbm %s548_s1, 256 }
  0x46   : > { %p321_p5 = scmp.ne.s32.totalorder %s505_s30, %s320_s5  ;;  %p325_p0 = scmp.lt.u32.totalorder %s505_s30, %s548_s1 }
  0x47   : > { %p326_p1 = scmp.lt.u32.totalorder %s324_s14, %s320_s5  ;;  %p328_p6 = scmp.lt.u32.totalorder %s320_s5, %s505_s30 }
  0x48   : > { %p322_p8 = pnand %p321_p5, %p557_p11 }
  0x49   : > { %p327_p3 = por %p326_p1, %p325_p0 }
  0x4a   : > { %p323_p9 = pneg %p322_p8 }
  0x4b   : > { %p329_p12 = por %p328_p6, %p327_p3 }
  0x4d   : > { %p330_p13 = pnand %p329_p12, %p323_p9 }
  0x4f   : > { %333 = shalt.err (!%p330_p13)
}
  0x50   : > { %232 = dma.vmem_to_hbm [thread:$0]  (%p557_p11), %s500_s26, 128, %s505_s30, %s135_s17  }
  0x51 PF: > { %s160_s21 = sand.u32 1, %s360_s6   ;;  %p558_p7 = scmp.ne.s32.totalorder %s553_s19, 0 }
  0x52   : > { %p559_p10 = scmp.ge.s32.totalorder %s372_s9, 2  ;;  %s161_s22 = scalar_lea.sflag [#allocation4], %s160_s21 }
  0x54   : > { %p239_p2 = pnand %p559_p10, %p558_p7 }
  0x56   : > { %355 = dma.done.wait (!%p239_p2), %s161_s22, 128  }
  0x57   : > { %357 = vsyncadd (!%p239_p2), %s161_s22, 4294967168  ;;  %p14_p4 = scmp.ge.s32.totalorder %s411_s12, 4   ;;  %s560_s6 = smov %s364_s7 }
  0x58   : > { %s561_s7 = smov %s368_s8  ;;  %s562_s8 = smov %s423_s15 }
  0x59   : > { %s563_s9 = smov %s411_s12  ;;  %16 = sbr.rel (!%p14_p4) target bundleno = 5 (0x5), region = 69 }
  0x60   :  { %166 = vsyncpa [#allocation3], 1 }
  0x61   :  { %168 = vsyncpa [#allocation3 + $0x1], 1 }
  0x62   :  { %169 = vsyncpa [#allocation4], 1 }
  0x63   :  { %171 = vsyncpa [#allocation4 + $0x1], 1 }

</bundles_post_ra>
